<compile_context>
chip_gen: v7x
topology: tpu7x:2x2x1
jax: 0.10.0
libtpu: 0.0.40
codegen_flags: <defaults>
</compile_context>

<pallas_src>
import jax
import jax.numpy as jnp
from jax import lax
from jax.experimental import pallas as pl
from jax.experimental.pallas import tpu as pltpu


# ----------------------------------------------------------------------------
# Pallas kernel: CAM head
#   x = relu(layer4(x)); x = dropout (identity in eval); x = global avg pool;
#   x = 1x1 conv classifier (+ bias); x = flatten -> (N, K)
# ----------------------------------------------------------------------------
def cam_head_kernel(feats_ref, w_ref, b_ref, out_ref):
    # feats_ref: (Nb, HW, C) bf16 -- channels-last: C on the 128-wide lane axis
    # w_ref:     (C, Kp) f32      -- classifier weight^T, pre-scaled by 1/HW
    # b_ref:     (1, Kp) f32      -- classifier bias, cols >= K are 0
    # out_ref:   (Nb, Kp) f32
    x = feats_ref[...].astype(jnp.float32)      # upcast before elementwise (v5e: no bf16 VPU)
    x = jnp.maximum(x, 0.0)                     # F.relu(layer4(x))  (VPU)
    # TODO(synk): Dropout2d(0.5) is identity in eval/inference mode; omitted here.

    # Global average pool: sublane-axis sum over HW (XLU slot, no MXU / relayout);
    # the 1/HW scale is folded into w_ref.
    pooled = jnp.sum(x, axis=1)                                         # (Nb, C)

    # 1x1-conv classifier for the whole row block: (Nb, C) . (C, Kp) -> (Nb, Kp).
    logits = jnp.dot(pooled, w_ref[...], preferred_element_type=jnp.float32)

    out_ref[...] = (logits + b_ref[...]).astype(out_ref.dtype)


def cam_head(feats_nhwc, w_cls, b_cls, *, batch_block=None):
    """feats_nhwc: (N, H, W, C); w_cls: (K, C, 1, 1); b_cls: (K,) -> logits (N, K)."""
    N, H, W, C = feats_nhwc.shape
    HW = H * W
    K = w_cls.shape[0]
    Kp = ((K + 127) // 128) * 128                  # lane-dense output width

    # Free reshape only (NHWC -> (N, HW, C)); bf16 halves the head's HBM read
    # traffic (the cast fuses into the backbone's final elementwise op under jit).
    feats = feats_nhwc.reshape(N, HW, C).astype(jnp.bfloat16)

    # Fold the 1/HW average-pool scale into the classifier weight, transpose to
    # (C, Kp) so the contraction dim is on sublanes / output classes on lanes,
    # and zero-pad the class dim K -> Kp (padded cols are exactly zero).
    wm = jnp.pad(w_cls.reshape(K, C).T * (1.0 / HW), ((0, 0), (0, Kp - K)))  # (C, Kp)
    bm = jnp.pad(b_cls.reshape(1, K), ((0, 0), (0, Kp - K)))                 # (1, Kp)

    # Rows (images) per grid step: big enough to amortize per-step overhead and
    # fill MXU rows, capped so the double-buffered feature block fits comfortably
    # in v7x's smaller (64 MiB physical / 32 MiB scoped) VMEM, and small enough
    # that N >= 2 still gives >= 2 "parallel" steps for v7x's two TensorCores.
    if batch_block is None:
        max_rows_vmem = max(1, (12 << 20) // (2 * HW * C * feats.dtype.itemsize))
        nb = max(1, min(N, 128, max_rows_vmem))
        if N >= 2 and pl.cdiv(N, nb) < 2:
            nb = pl.cdiv(N, 2)
    else:
        nb = batch_block
    g = pl.cdiv(N, nb)

    cost = pl.CostEstimate(
        flops=2 * N * C * Kp,
        transcendentals=0,
        bytes_accessed=2 * N * C * HW + 4 * (C * Kp + Kp + g * nb * Kp),
    )

    # Grid over batch blocks ("parallel"); per-block feature DMA is auto
    # double-buffered against the previous block's relu/pool/matmul. Weight and
    # bias have constant index_maps so they are fetched once.
    out = pl.pallas_call(
        cam_head_kernel,
        out_shape=jax.ShapeDtypeStruct((g, nb, Kp), jnp.float32),
        grid=(g,),
        in_specs=[
            pl.BlockSpec((nb, HW, C), lambda i: (i, 0, 0)),   # (Nb, HW, C) per step
            pl.BlockSpec((C, Kp), lambda i: (0, 0)),
            pl.BlockSpec((1, Kp), lambda i: (0, 0)),
        ],
        out_specs=pl.BlockSpec((None, nb, Kp), lambda i: (i, 0, 0)),
        compiler_params=pltpu.CompilerParams(dimension_semantics=("parallel",)),
        cost_estimate=cost,
    )(feats, wm, bm)
    return out.reshape(g * nb, Kp)[:N, :K]


# ----------------------------------------------------------------------------
# ResNet-50 backbone (layer0 .. layer4) -- plain-JAX glue feeding the Pallas head.
# Runs channels-last (NHWC / HWIO), which is both what XLA:TPU prefers for the
# convolutions and what makes the layer4 features lane-dense for the kernel.
# TODO(synk): backbone convolutions stay on lax.conv (XLA); only the CAM head is a
#             hand-written Pallas kernel.
# ----------------------------------------------------------------------------
def conv2d(x, w, stride=1, padding=0):
    return lax.conv_general_dilated(
        x, w,
        window_strides=(stride, stride),
        padding=[(padding, padding), (padding, padding)],
        dimension_numbers=("NHWC", "HWIO", "NHWC"))


def bn_eval(x):
    # BatchNorm2d in eval mode with gamma=1, beta=0, running_mean=0, running_var=1.
    # (Intentional: pretrained running stats are not loaded.)
    eps = 1e-5
    return x * (1.0 / jnp.sqrt(1.0 + eps))


def relu(x):
    return jnp.maximum(x, 0.0)


def maxpool3x3_s2(x):
    return lax.reduce_window(
        x, jnp.float32(-jnp.inf), lax.max,
        window_dimensions=(1, 3, 3, 1),
        window_strides=(1, 2, 2, 1),
        padding=[(0, 0), (1, 1), (1, 1), (0, 0)])


def bottleneck(x, blk):
    s = blk["stride"]
    out = relu(bn_eval(conv2d(x, blk["w1"])))                         # 1x1
    out = relu(bn_eval(conv2d(out, blk["w2"], stride=s, padding=1)))  # 3x3 (stride here)
    out = bn_eval(conv2d(out, blk["w3"]))                             # 1x1 expand
    if "wd" in blk:
        identity = bn_eval(conv2d(x, blk["wd"], stride=s))            # downsample
    else:
        identity = x
    return relu(out + identity)


def backbone(params, x_nhwc):
    # layer0: conv7x7 s2 p3 -> bn -> relu -> maxpool3x3 s2 p1
    x = relu(bn_eval(conv2d(x_nhwc, params["conv1"], stride=2, padding=3)))
    x = maxpool3x3_s2(x)
    for name in ("layer1", "layer2", "layer3", "layer4"):
        for blk in params[name]:
            x = bottleneck(x, blk)
    return x  # (N, H/32, W/32, 2048)


def cam_forward(params, x_nchw):
    x = jnp.transpose(x_nchw, (0, 2, 3, 1))          # module takes NCHW; go NHWC once
    feats = backbone(params, x)
    return cam_head(feats, params["cls_w"], params["cls_b"])  # (N, 20)


# ----------------------------------------------------------------------------
# Deterministic parameter initialization (shapes from ResNet-50 + 1x1 classifier)
# ----------------------------------------------------------------------------
def init_params(key):
    keys = iter(jax.random.split(key, 64))

    def conv_init(shape):  # HWIO
        k = next(keys)
        fan_in = shape[0] * shape[1] * shape[2]
        return jax.random.normal(k, shape, dtype=jnp.float32) / jnp.sqrt(jnp.float32(fan_in))

    params = {"conv1": conv_init((7, 7, 3, 64))}

    def make_layer(in_ch, planes, blocks, stride):
        layer = []
        for i in range(blocks):
            s = stride if i == 0 else 1
            blk = {
                "w1": conv_init((1, 1, in_ch, planes)),
                "w2": conv_init((3, 3, planes, planes)),
                "w3": conv_init((1, 1, planes, planes * 4)),
                "stride": s,
            }
            if s != 1 or in_ch != planes * 4:
                blk["wd"] = conv_init((1, 1, in_ch, planes * 4))
            layer.append(blk)
            in_ch = planes * 4
        return layer, in_ch

    in_ch = 64
    params["layer1"], in_ch = make_layer(in_ch, 64, 3, 1)
    params["layer2"], in_ch = make_layer(in_ch, 128, 4, 2)
    params["layer3"], in_ch = make_layer(in_ch, 256, 6, 2)
    params["layer4"], in_ch = make_layer(in_ch, 512, 3, 2)

    # classifier: Conv2d(2048, 20, 1, bias=True), xavier_uniform_ weight (kept in
    # PyTorch's OIHW layout; transposed/padded inside cam_head).
    k_w, k_b = next(keys), next(keys)
    fan_in, fan_out = 2048, 20
    bound = float(jnp.sqrt(6.0 / (fan_in + fan_out)))
    params["cls_w"] = jax.random.uniform(k_w, (20, 2048, 1, 1), jnp.float32, -bound, bound)
    bbound = 1.0 / float(jnp.sqrt(fan_in))
    params["cls_b"] = jax.random.uniform(k_b, (20,), jnp.float32, -bbound, bbound)
    return params


if __name__ == "__main__":
    key = jax.random.PRNGKey(0)
    k_params, k_x = jax.random.split(key)
    params = init_params(k_params)

    # Small image batch: (N=2, C=3, H=64, W=64) -> layer4 features (2, 2, 2, 2048)
    x = jax.random.normal(k_x, (2, 3, 64, 64), dtype=jnp.float32)

    fwd = jax.jit(lambda inp: cam_forward(params, inp))
    out = jax.block_until_ready(fwd(x))
    assert out.shape == (2, 20)

    # quiet correctness check against a plain-JAX reference of the head
    feats = backbone(params, jnp.transpose(x, (0, 2, 3, 1)))   # (N, h, w, 2048)
    N, H, W, C = feats.shape
    f = jnp.maximum(feats.astype(jnp.bfloat16).astype(jnp.float32), 0.0)
    pooled = jnp.mean(f.reshape(N, H * W, C), axis=1)
    ref = pooled @ params["cls_w"].reshape(20, C).T + params["cls_b"]
    assert jnp.allclose(out, ref, atol=1e-2, rtol=1e-2)

    print("KERNEL_OK")
</pallas_src>

<mosaic_0001>
module attributes {stable_mosaic.version = 11 : i64} {
  func.func @cam_head_kernel(%arg0: i32, %arg1: memref<1x4x2048xbf16, #tpu.memory_space<vmem>>, %arg2: memref<2048x128xf32, #tpu.memory_space<vmem>>, %arg3: memref<1x128xf32, #tpu.memory_space<vmem>>, %arg4: memref<1x1x128xf32, #tpu.memory_space<vmem>>) attributes {dimension_semantics = [#tpu.dimension_semantics<parallel>], iteration_bounds = array<i64: 2>, scalar_prefetch = 0 : i64, scratch_operands = 0 : i64, tpu.core_type = #tpu.core_type<tc>, window_params = [{transform_indices = @transform_0, window_bounds = array<i64: 1, 4, 2048>}, {pipeline_mode = #tpu.pipeline_mode<synchronous>, transform_indices = @transform_1, window_bounds = array<i64: 2048, 128>}, {pipeline_mode = #tpu.pipeline_mode<synchronous>, transform_indices = @transform_2, window_bounds = array<i64: 1, 128>}, {transform_indices = @transform_3, window_bounds = array<i64: 1, 1, 128>}]} {
    %c0 = arith.constant 0 : index
    %c0_0 = arith.constant 0 : index
    %c0_1 = arith.constant 0 : index
    %0 = vector.load %arg1[%c0, %c0_0, %c0_1] : memref<1x4x2048xbf16, #tpu.memory_space<vmem>>, vector<1x4x2048xbf16>
    %1 = arith.extf %0 : vector<1x4x2048xbf16> to vector<1x4x2048xf32>
    %cst = arith.constant 0.000000e+00 : f32
    %2 = vector.broadcast %cst : f32 to vector<1x4x2048xf32>
    %3 = arith.maximumf %1, %2 : vector<1x4x2048xf32>
    %cst_2 = arith.constant dense<0.000000e+00> : vector<1x2048xf32>
    %4 = vector.multi_reduction <add>, %3, %cst_2 [1] : vector<1x4x2048xf32> to vector<1x2048xf32>
    %c0_3 = arith.constant 0 : index
    %c0_4 = arith.constant 0 : index
    %5 = vector.load %arg2[%c0_3, %c0_4] : memref<2048x128xf32, #tpu.memory_space<vmem>>, vector<2048x128xf32>
    %cst_5 = arith.constant dense<0.000000e+00> : vector<1x128xf32>
    %6 = tpu.matmul %4, %5, %cst_5 {dimension_numbers = #tpu.dot_dimension_numbers<[1], [0], [0], [1], [0, 0, 1, 1], [], []>} : vector<1x2048xf32>, vector<2048x128xf32>, vector<1x128xf32> -> vector<1x128xf32>
    %c0_6 = arith.constant 0 : index
    %c0_7 = arith.constant 0 : index
    %7 = vector.load %arg3[%c0_6, %c0_7] : memref<1x128xf32, #tpu.memory_space<vmem>>, vector<1x128xf32>
    %8 = arith.addf %6, %7 : vector<1x128xf32>
    %c0_8 = arith.constant 0 : index
    %c0_9 = arith.constant 0 : index
    %c0_10 = arith.constant 0 : index
    %9 = vector.load %arg4[%c0_8, %c0_9, %c0_10] : memref<1x1x128xf32, #tpu.memory_space<vmem>>, vector<1x1x128xf32>
    %10 = vector.shape_cast %9 : vector<1x1x128xf32> to vector<1x128xf32>
    %11 = vector.shape_cast %8 : vector<1x128xf32> to vector<1x1x128xf32>
    tpu.vector_store %arg4[%c0_8, %c0_9, %c0_10], %11 {strides = array<i32>} : memref<1x1x128xf32, #tpu.memory_space<vmem>>, vector<1x1x128xf32>,
    return
  }
  func.func @transform_0(%arg0: i32) -> (i32, i32, i32) {
    %c0_i32 = arith.constant 0 : i32
    %c0_i32_0 = arith.constant 0 : i32
    %c0_i32_1 = arith.constant 0 : i32
    return %arg0, %c0_i32, %c0_i32_0 : i32, i32, i32
  }
  func.func @transform_1(%arg0: i32) -> (i32, i32) {
    %c0_i32 = arith.constant 0 : i32
    %c0_i32_0 = arith.constant 0 : i32
    %c0_i32_1 = arith.constant 0 : i32
    return %c0_i32, %c0_i32_0 : i32, i32
  }
  func.func @transform_2(%arg0: i32) -> (i32, i32) {
    %c0_i32 = arith.constant 0 : i32
    %c0_i32_0 = arith.constant 0 : i32
    %c0_i32_1 = arith.constant 0 : i32
    return %c0_i32, %c0_i32_0 : i32, i32
  }
  func.func @transform_3(%arg0: i32) -> (i32, i32, i32) {
    %c0_i32 = arith.constant 0 : i32
    %c0_i32_0 = arith.constant 0 : i32
    %c0_i32_1 = arith.constant 0 : i32
    return %arg0, %c0_i32, %c0_i32_0 : i32, i32, i32
  }
}

</mosaic_0001>

<bundles_post_ra>
// kernel: _lambda_.1
= control target key start
LH: loop header
LB: loop body
LE: loop exit
PB: predicated region body
PF: predicated region fallthrough
CT: control target
= control target key end

     0   :  { %8 = vsyncpa [#allocation3], 0  ;;  %s2799_s0 = inlined_call_operand.vmem [shape: bf16[2,4,2048], index: 0, kind: input, shape index: {}]   ;;  %s2800_s1 = inlined_call_operand.vmem [shape: f32[2048,128], index: 1, kind: input, shape index: {}]   ;;  %s2801_s2 = inlined_call_operand.vmem [shape: f32[1,128], index: 2, kind: input, shape index: {}]   ;;  %s2802_s3 = inlined_call_operand.hbm [shape: f32[2,1,128], index: 3, kind: output, shape index: {}]  }
   0x1   :  { %10 = vsyncpa [#allocation3 + $0x1], 0  ;;  %s1881_s12 = smov 0   ;;  %s1883_s13 = smov 0  }
   0x2   :  { %s1885_s14 = smov 0   ;;  %s1887_s15 = smov 0  }
   0x3 LB: > { %s1902_s16 = sadd.s32 4294967295, %s1858_s15   ;;  %s1211_s17 = sadd.s32 4294967294, %s1858_s15   ;;  %s1858_s15 = sphi %s1887_s15, %s2808_s15   ;;  %s1854_s14 = sphi %s1885_s14, %s2807_s14   ;;  %s1850_s13 = sphi %s1883_s13, %s2806_s13   ;;  %s1846_s12 = sphi %s1881_s12, %s2805_s12  }
   0x4   : > { %s1906_s18 = sadd.s32 1, %s1858_s15   ;;  %s91_s19 = sadd.s32 1, %s1854_s14 }
   0x5   : > { %s88_s20 = ssub.s32 %s1858_s15, %s1906_s18  ;;  %p101_p0 = scmp.ne.s32.totalorder %s1854_s14, %s1850_s13 }
   0x6   : > { %p89_p1 = scmp.eq.s32.totalorder %s88_s20, 0  ;;  %p102_p2 = scmp.eq.s32.totalorder %s1902_s16, 1 }
   0x7   : > { %p107_p3 = scmp.ne.s32.totalorder %s1850_s13, %s1846_s12  ;;  %p108_p4 = scmp.eq.s32.totalorder %s1211_s17, 1 }
   0x8   : > { %s1917_s21 = scalar_select %p89_p1, %s1854_s14, %s91_s19  }
   0x9   : > { %p1919_p5 = por %p102_p2, %p101_p0  ;;  %p1923_p6 = por %p108_p4, %p107_p3 }
   0xa   : > { %p1214_p7 = scmp.ge.s32.totalorder %s1858_s15, 1  ;;  %p140_p8 = scmp.lt.s32.totalorder %s1858_s15, 3 }
   0xc   : > { %p141_p9 = pnand %p1214_p7, %p140_p8 }
   0xd   : > { %v341_v0 = vld [vmem:[%s2800_s1 + $0x80] sm:$0xff] (!%p141_p9)  ;;  %v342_v1 = vld [vmem:[%s2800_s1 + $0x88] sm:$0xff] (!%p141_p9)  ;;  %v343_v11 = vld [vmem:[%s2800_s1 + $0x90] sm:$0xff] (!%p141_p9)  ;;  %p163_p10 = scmp.lt.s32.totalorder (!%p141_p9), %s1902_s16, 1  ;;  %vm212_vm0 = vcmask (!%p141_p9), 1043456   ;;  %s161_s7 = sand.u32 (!%p141_p9), 1, %s1850_s13  }
   0xe   : > { %144 = sbr.rel (%p141_p9) target bundleno = 382 (0x17e), region = 32  ;;  %v325_v2 = vld [vmem:[%s2800_s1] sm:$0xff] (!%p141_p9)  ;;  %v1501_v3 = vpack.c.bf16 (!%p141_p9), %v342_v1, %v341_v0  ;;  %v326_v4 = vld [vmem:[%s2800_s1 + $0x8] sm:$0xff] (!%p141_p9)  ;;  %v344_v13 = vld [vmem:[%s2800_s1 + $0x98] sm:$0xff] (!%p141_p9)  ;;  %s1217_s8 = sshll.u32 (!%p141_p9), %s1902_s16, 4 }
   0xf   : > { %v373_v5 = vld [vmem:[%s2800_s1 + $0x180] sm:$0xff] (!%p141_p9)  ;;  %v374_v6 = vld [vmem:[%s2800_s1 + $0x188] sm:$0xff] (!%p141_p9)  ;;  %v1503_v7 = vpack.c.bf16 (!%p141_p9), %v326_v4, %v325_v2  ;;  %v327_v14 = vld [vmem:[%s2800_s1 + $0x10] sm:$0xff] (!%p141_p9)  ;;  %v1505_v16 = vpack.c.bf16 (!%p141_p9), %v344_v13, %v343_v11  ;;  %s162_s9 = scalar_lea.vmem (!%p141_p9), [#allocation2], %s161_s7  ;;  %s2757_s25 = scalar_lea.hbm (!%p141_p9), %s2802_s3, %s1217_s8 }
  0x10   : > { %v1533_v8 = vpack.c.bf16 (!%p141_p9), %v374_v6, %v373_v5  ;;  %v357_v9 = vld [vmem:[%s2800_s1 + $0x100] sm:$0xff] (!%p141_p9)  ;;  %v358_v10 = vld [vmem:[%s2800_s1 + $0x108] sm:$0xff] (!%p141_p9)  ;;  %1502 = vmatprep.subr.bf16.mxu0 (!%p141_p9), %v1501_v3  ;;  %v328_v15 = vld [vmem:[%s2800_s1 + $0x18] sm:$0xff] (!%p141_p9)  ;;  %s1156_s10 = sshll.u32 (!%p141_p9), %s162_s9, 4  ;;  %s1144_s26 = scalar_lea.sflag (!%p141_p9), [#allocation3], %s161_s7  ;;  %s2759_s10 = int_to_ptr.vmem [resolvable:$true] %s1156_s10 }
  0x11   : > { %v1535_v12 = vpack.c.bf16 (!%p141_p9), %v358_v10, %v357_v9  ;;  %1504 = vmatpush3.bf16.msra.mxu0 (!%p141_p9), %v1503_v7  ;;  %v1507_v17 = vpack.c.bf16 (!%p141_p9), %v328_v15, %v327_v14  ;;  %v375_v18 = vld [vmem:[%s2800_s1 + $0x190] sm:$0xff] (!%p141_p9)  ;;  %v376_v19 = vld [vmem:[%s2800_s1 + $0x198] sm:$0xff] (!%p141_p9)  ;;  %v345_v23 = vld [vmem:[%s2800_s1 + $0xa0] sm:$0xff] (!%p141_p9)  ;;  %s1796_s27 = scalar_lea.vmem (!%p141_p9), %s2759_s10, 16 }
  0x12   : > { %1534 = vmatprep.subr.bf16.mxu1 (!%p141_p9), %v1533_v8  ;;  %v359_v20 = vld [vmem:[%s2800_s1 + $0x110] sm:$0xff] (!%p141_p9)  ;;  %v1537_v21 = vpack.c.bf16 (!%p141_p9), %v376_v19, %v375_v18  ;;  %v360_v22 = vld [vmem:[%s2800_s1 + $0x118] sm:$0xff] (!%p141_p9)  ;;  %v346_v24 = vld [vmem:[%s2800_s1 + $0xa8] sm:$0xff] (!%p141_p9)  ;;  %1506 = vmatprep.subr.bf16.mxu0 (!%p141_p9), %v1505_v16  ;;  %p1797_p11 = scmp.ne.s32.totalorder (!%p141_p9), %s2759_s10, %s1796_s27 }
  0x13   : > { %1536 = vmatpush3.bf16.msra.mxu1 (!%p141_p9), %v1535_v12  ;;  %v1539_v25 = vpack.c.bf16 (!%p141_p9), %v360_v22, %v359_v20  ;;  %v1509_v26 = vpack.c.bf16 (!%p141_p9), %v346_v24, %v345_v23  ;;  %v329_v27 = vld [vmem:[%s2800_s1 + $0x20] sm:$0xff] (!%p141_p9)  ;;  %v330_v28 = vld [vmem:[%s2800_s1 + $0x28] sm:$0xff] (!%p141_p9)  ;;  %v347_v35 = vld [vmem:[%s2800_s1 + $0xb0] sm:$0xff] (!%p141_p9) }
  0x14   : > { %v377_v29 = vld [vmem:[%s2800_s1 + $0x1a0] sm:$0xff] (!%p141_p9)  ;;  %1538 = vmatprep.subr.bf16.mxu1 (!%p141_p9), %v1537_v21  ;;  %v378_v30 = vld [vmem:[%s2800_s1 + $0x1a8] sm:$0xff] (!%p141_p9)  ;;  %v1511_v33 = vpack.c.bf16 (!%p141_p9), %v330_v28, %v329_v27  ;;  %v348_v36 = vld [vmem:[%s2800_s1 + $0xb8] sm:$0xff] (!%p141_p9)  ;;  %p1798_p12 = pnand (!%p141_p9), %p1797_p11, %p1919_p5 }
  0x15   : > { %v361_v31 = vld [vmem:[%s2800_s1 + $0x120] sm:$0xff]  ;;  %v362_v32 = vld [vmem:[%s2800_s1 + $0x128] sm:$0xff]  ;;  %1508 = vmatpush3.bf16.msra.mxu0 %v1507_v17  ;;  %v1541_v34 = vpack.c.bf16 %v378_v30, %v377_v29  ;;  %v331_v37 = vld [vmem:[%s2800_s1 + $0x30] sm:$0xff]  ;;  %v1513_v39 = vpack.c.bf16 %v348_v36, %v347_v35  ;;  %s2035_s11 = scalar_select %p163_p10, %s1902_s16, 1 }
  0x16   : > { %1510 = vmatprep.subr.bf16.mxu0 %v1509_v26  ;;  %v1543_v38 = vpack.c.bf16 %v362_v32, %v361_v31  ;;  %v332_v40 = vld [vmem:[%s2800_s1 + $0x38] sm:$0xff]  ;;  %v379_v41 = vld [vmem:[%s2800_s1 + $0x1b0] sm:$0xff]  ;;  %v349_v46 = vld [vmem:[%s2800_s1 + $0xc0] sm:$0xff]  ;;  %p1799_p13 = pneg %p1798_p12  ;;  %s1860_s16 = smov [#allocation2]  }
  0x17   : > { %1540 = vmatpush3.bf16.msra.mxu1 %v1539_v25  ;;  %v380_v42 = vld [vmem:[%s2800_s1 + $0x1b8] sm:$0xff]  ;;  %v363_v44 = vld [vmem:[%s2800_s1 + $0x130] sm:$0xff]  ;;  %v350_v47 = vld [vmem:[%s2800_s1 + $0xc8] sm:$0xff]  ;;  %v1515_v48 = vpack.c.bf16 %v332_v40, %v331_v37  ;;  %s1220_s24 = sshll.u32 %s2035_s11, 5  ;;  %s1800_s28 = sshll.u32 %s1860_s16, 4  ;;  %s1801_s28 = int_to_ptr.vmem [resolvable:$false] %s1800_s28 }
  0x18   : > { %1542 = vmatprep.subr.bf16.mxu1 %v1541_v34  ;;  %v1545_v43 = vpack.c.bf16 %v380_v42, %v379_v41  ;;  %v364_v45 = vld [vmem:[%s2800_s1 + $0x138] sm:$0xff]  ;;  %v381_v49 = vld [vmem:[%s2800_s1 + $0x1c0] sm:$0xff]  ;;  %v382_v50 = vld [vmem:[%s2800_s1 + $0x1c8] sm:$0xff]  ;;  %v1517_v52 = vpack.c.bf16 %v350_v47, %v349_v46  ;;  %s2089_s17 = scalar_lea.vmem %s2799_s0, %s1220_s24  ;;  %s1802_s29 = scalar_lea.vmem %s1801_s28, 32 }
  0x19   : > { %1512 = vmatpush3.bf16.msra.mxu0 %v1511_v33  ;;  %v1547_v51 = vpack.c.bf16 %v364_v45, %v363_v44  ;;  %v333_v53 = vld [vmem:[%s2800_s1 + $0x40] sm:$0xff]  ;;  %v334_v54 = vld [vmem:[%s2800_s1 + $0x48] sm:$0xff]  ;;  %v1549_v56 = vpack.c.bf16 %v382_v50, %v381_v49  ;;  %v351_v58 = vld [vmem:[%s2800_s1 + $0xd0] sm:$0xff]  ;;  %p1803_p0 = scmp.lt.s32.totalorder %s2759_s10, %s1801_s28  ;;  %p1804_p1 = scmp.lt.s32.totalorder %s1802_s29, %s1796_s27 }
  0x1a   : > { %1514 = vmatprep.subr.bf16.mxu0 %v1513_v39  ;;  %v365_v55 = vld [vmem:[%s2800_s1 + $0x140] sm:$0xff]  ;;  %v366_v57 = vld [vmem:[%s2800_s1 + $0x148] sm:$0xff]  ;;  %v352_v59 = vld [vmem:[%s2800_s1 + $0xd8] sm:$0xff]  ;;  %v1519_v62 = vpack.c.bf16 %v334_v54, %v333_v53 }
  0x1b   : > { %1544 = vmatpush3.bf16.msra.mxu1 %v1543_v38  ;;  %v383_v60 = vld [vmem:[%s2800_s1 + $0x1d0] sm:$0xff]  ;;  %v384_v61 = vld [vmem:[%s2800_s1 + $0x1d8] sm:$0xff]  ;;  %v1551_v63 = vpack.c.bf16 %v366_v57, %v365_v55  ;;  %v1521_v0 = vpack.c.bf16 %v352_v59, %v351_v58  ;;  %v353_v6 = vld [vmem:[%s2800_s1 + $0xe0] sm:$0xff]  ;;  %p1805_p2 = por %p1804_p1, %p1803_p0 }
  0x1c   : > { %1546 = vmatprep.subr.bf16.mxu1 %v1545_v43  ;;  %v335_v1 = vld [vmem:[%s2800_s1 + $0x50] sm:$0xff]  ;;  %v336_v2 = vld [vmem:[%s2800_s1 + $0x58] sm:$0xff]  ;;  %v1553_v4 = vpack.c.bf16 %v384_v61, %v383_v60  ;;  %v354_v7 = vld [vmem:[%s2800_s1 + $0xe8] sm:$0xff] }
  0x1d   : > { %1516 = vmatpush3.bf16.msra.mxu0 %v1515_v48  ;;  %v367_v3 = vld [vmem:[%s2800_s1 + $0x150] sm:$0xff]  ;;  %v368_v5 = vld [vmem:[%s2800_s1 + $0x158] sm:$0xff]  ;;  %v385_v8 = vld [vmem:[%s2800_s1 + $0x1e0] sm:$0xff]  ;;  %v1523_v10 = vpack.c.bf16 %v336_v2, %v335_v1  ;;  %v1525_v15 = vpack.c.bf16 %v354_v7, %v353_v6  ;;  %p1806_p3 = pnand %p1805_p2, %p1799_p13 }
  0x1e   : > { %1518 = vmatprep.subr.bf16.mxu0 %v1517_v52  ;;  %v386_v9 = vld [vmem:[%s2800_s1 + $0x1e8] sm:$0xff]  ;;  %v337_v11 = vld [vmem:[%s2800_s1 + $0x60] sm:$0xff]  ;;  %v1555_v14 = vpack.c.bf16 %v368_v5, %v367_v3  ;;  %v355_v17 = vld [vmem:[%s2800_s1 + $0xf0] sm:$0xff] }
  0x1f   : > { %1548 = vmatpush3.bf16.msra.mxu1 %v1547_v51  ;;  %v338_v12 = vld [vmem:[%s2800_s1 + $0x68] sm:$0xff]  ;;  %v369_v13 = vld [vmem:[%s2800_s1 + $0x160] sm:$0xff]  ;;  %v1557_v19 = vpack.c.bf16 %v386_v9, %v385_v8  ;;  %v356_v20 = vld [vmem:[%s2800_s1 + $0xf8] sm:$0xff] }
  0x20   : > { %1550 = vmatprep.subr.bf16.mxu1 %v1549_v56  ;;  %v370_v16 = vld [vmem:[%s2800_s1 + $0x168] sm:$0xff]  ;;  %v168_v18 = vld [vmem:[%s2089_s17] sm:$0xff]  ;;  %v387_v21 = vld [vmem:[%s2800_s1 + $0x1f0] sm:$0xff]  ;;  %v1527_v25 = vpack.c.bf16 %v338_v12, %v337_v11  ;;  %v1529_v32 = vpack.c.bf16 %v356_v20, %v355_v17 }
  0x21   : > { %1520 = vmatpush3.bf16.msra.mxu0 %v1519_v62  ;;  %v388_v22 = vld [vmem:[%s2800_s1 + $0x1f8] sm:$0xff]  ;;  %v172_v23 = vunpack.c.l.bf16 %v168_v18  ;;  %v173_v24 = vunpack.c.h.bf16 %v168_v18  ;;  %v339_v26 = vld [vmem:[%s2800_s1 + $0x70] sm:$0xff]  ;;  %v1559_v31 = vpack.c.bf16 %v370_v16, %v369_v13  ;;  %v405_v35 = vld [vmem:[%s2800_s1 + $0x280] sm:$0xff] }
  0x22   : > { %1522 = vmatprep.subr.bf16.mxu0 %v1521_v0  ;;  %v340_v27 = vld [vmem:[%s2800_s1 + $0x78] sm:$0xff]  ;;  %v371_v28 = vld [vmem:[%s2800_s1 + $0x170] sm:$0xff]  ;;  %v1561_v33 = vpack.c.bf16 %v388_v22, %v387_v21  ;;  %v406_v36 = vld [vmem:[%s2800_s1 + $0x288] sm:$0xff] }
  0x23   : > { %1552 = vmatpush3.bf16.msra.mxu1 %v1551_v63  ;;  %v180_v29 = vmax.f32 %v172_v23, 0.0  ;;  %v181_v30 = vmax.f32 %v173_v24, 0.0  ;;  %v372_v34 = vld [vmem:[%s2800_s1 + $0x178] sm:$0xff]  ;;  %v1531_v41 = vpack.c.bf16 %v340_v27, %v339_v26  ;;  %v437_v43 = vld [vmem:[%s2800_s1 + $0x380] sm:$0xff]  ;;  %v438_v44 = vld [vmem:[%s2800_s1 + $0x388] sm:$0xff]  ;;  %v1565_v48 = vpack.c.bf16 %v406_v36, %v405_v35 }
  0x24   : > { %1554 = vmatprep.subr.bf16.mxu1 %v1553_v4  ;;  %v1563_v46 = vpack.c.bf16 %v372_v34, %v371_v28  ;;  %v1597_v54 = vpack.c.bf16 %v438_v44, %v437_v43  ;;  %v389_v2 = vld [vmem:[%s2800_s1 + $0x200] sm:$0xff]  ;;  %v390_v3 = vld [vmem:[%s2800_s1 + $0x208] sm:$0xff]  ;;  %v407_v7 = vld [vmem:[%s2800_s1 + $0x290] sm:$0xff] }
  0x25   : > { %1524 = vmatpush3.bf16.msra.mxu0 %v1523_v10  ;;  %v196_v37 = vcombine.high %v180_v29, %v180_v29  ;;  %v213_v38 = vsel %vm212_vm0, %v180_v29, 0.0  ;;  %v197_v39 = vcombine.high %v181_v30, %v181_v30  ;;  %v227_v40 = vsel %vm212_vm0, %v181_v30, 0.0  ;;  %v421_v5 = vld [vmem:[%s2800_s1 + $0x300] sm:$0xff]  ;;  %v422_v6 = vld [vmem:[%s2800_s1 + $0x308] sm:$0xff]  ;;  %v408_v10 = vld [vmem:[%s2800_s1 + $0x298] sm:$0xff] }
  0x26   : > { %1526 = vmatprep.subr.bf16.mxu0 %v1525_v15  ;;  %v214_v42 = vrot.slane %v213_v38, 4  ;;  %v228_v45 = vrot.slane %v227_v40, 4  ;;  %v439_v11 = vld [vmem:[%s2800_s1 + $0x390] sm:$0xff]  ;;  %v440_v12 = vld [vmem:[%s2800_s1 + $0x398] sm:$0xff]  ;;  %v1567_v17 = vpack.c.bf16 %v390_v3, %v389_v2  ;;  %v1599_v18 = vpack.c.bf16 %v422_v6, %v421_v5  ;;  %v410_v26 = vld [vmem:[%s2800_s1 + $0x2a8] sm:$0xff] }
  0x27   : > { %1556 = vmatpush3.bf16.msra.mxu1 %v1555_v14  ;;  %v220_v47 = vsel %vm212_vm0, %v196_v37, 0.0  ;;  %v234_v49 = vsel %vm212_vm0, %v197_v39, 0.0  ;;  %v392_v20 = vld [vmem:[%s2800_s1 + $0x218] sm:$0xff]  ;;  %v1569_v21 = vpack.c.bf16 %v408_v10, %v407_v7  ;;  %v1601_v22 = vpack.c.bf16 %v440_v12, %v439_v11  ;;  %v423_v23 = vld [vmem:[%s2800_s1 + $0x310] sm:$0xff]  ;;  %v441_v27 = vld [vmem:[%s2800_s1 + $0x3a0] sm:$0xff] }
  0x28   : > { %1558 = vmatprep.subr.bf16.mxu1 %v1557_v19  ;;  %v221_v50 = vrot.slane %v220_v47, 4  ;;  %v215_v51 = vadd.f32 %v214_v42, %v213_v38  ;;  %v235_v52 = vrot.slane %v234_v49, 4  ;;  %v229_v53 = vadd.f32 %v228_v45, %v227_v40  ;;  %v391_v19 = vld [vmem:[%s2800_s1 + $0x210] sm:$0xff]  ;;  %v424_v24 = vld [vmem:[%s2800_s1 + $0x318] sm:$0xff]  ;;  %v442_v28 = vld [vmem:[%s2800_s1 + $0x3a8] sm:$0xff] }
  0x29   : > { %1528 = vmatpush3.bf16.msra.mxu0 %v1527_v25  ;;  %v409_v25 = vld [vmem:[%s2800_s1 + $0x2a0] sm:$0xff]  ;;  %v394_v30 = vld [vmem:[%s2800_s1 + $0x228] sm:$0xff]  ;;  %v411_v35 = vld [vmem:[%s2800_s1 + $0x2b0] sm:$0xff]  ;;  %v1605_v38 = vpack.c.bf16 %v442_v28, %v441_v27 }
  0x2a   : > { %1530 = vmatprep.subr.bf16.mxu0 %v1529_v32  ;;  %v222_v55 = vadd.f32 %v221_v50, %v220_v47  ;;  %v216_v56 = vrot.slane %v215_v51, 2  ;;  %v236_v57 = vadd.f32 %v235_v52, %v234_v49  ;;  %v230_v58 = vrot.slane %v229_v53, 2  ;;  %v393_v29 = vld [vmem:[%s2800_s1 + $0x220] sm:$0xff]  ;;  %v426_v34 = vld [vmem:[%s2800_s1 + $0x328] sm:$0xff]  ;;  %v412_v39 = vld [vmem:[%s2800_s1 + $0x2b8] sm:$0xff] }
  0x2b   : > { %1560 = vmatpush3.bf16.msra.mxu1 %v1559_v31  ;;  %v425_v31 = vld [vmem:[%s2800_s1 + $0x320] sm:$0xff]  ;;  %v1571_v32 = vpack.c.bf16 %v392_v20, %v391_v19  ;;  %v169_v36 = vld [vmem:[%s2089_s17 + $0x8] sm:$0xff]  ;;  %v1573_v37 = vpack.c.bf16 %v410_v26, %v409_v25  ;;  %v443_v40 = vld [vmem:[%s2800_s1 + $0x3b0] sm:$0xff]  ;;  %v1575_v44 = vpack.c.bf16 %v394_v30, %v393_v29 }
  0x2c   : > { %1562 = vmatprep.subr.bf16.mxu1 %v1561_v33  ;;  %v223_v59 = vrot.slane %v222_v55, 2  ;;  %v217_v60 = vadd.f32 %v216_v56, %v215_v51  ;;  %v237_v61 = vrot.slane %v236_v57, 2  ;;  %v231_v62 = vadd.f32 %v230_v58, %v229_v53  ;;  %v395_v49 = vld [vmem:[%s2800_s1 + $0x230] sm:$0xff]  ;;  %v396_v50 = vld [vmem:[%s2800_s1 + $0x238] sm:$0xff]  ;;  %v398_v5 = vld [vmem:[%s2800_s1 + $0x248] sm:$0xff] }
  0x2d   : > { %1532 = vmatpush3.bf16.msra.mxu0 %v1531_v41  ;;  %v1603_v33 = vpack.c.bf16 %v424_v24, %v423_v23  ;;  %v444_v41 = vld [vmem:[%s2800_s1 + $0x3b8] sm:$0xff]  ;;  %v174_v42 = vunpack.c.l.bf16 %v169_v36  ;;  %v175_v43 = vunpack.c.h.bf16 %v169_v36  ;;  %v1607_v47 = vpack.c.bf16 %v426_v34, %v425_v31  ;;  %v427_v52 = vld [vmem:[%s2800_s1 + $0x330] sm:$0xff]  ;;  %v429_v10 = vld [vmem:[%s2800_s1 + $0x340] sm:$0xff] }
  0x2e   : > { %1566 = vmatprep.subr.bf16.mxu0 %v1565_v48  ;;  %v224_v63 = vadd.f32 %v223_v59, %v222_v55  ;;  %v218_v0 = vrot.slane %v217_v60, 1  ;;  %v238_v1 = vadd.f32 %v237_v61, %v236_v57  ;;  %v232_v4 = vrot.slane %v231_v62, 1  ;;  %v428_v53 = vld [vmem:[%s2800_s1 + $0x338] sm:$0xff]  ;;  %v414_v59 = vld [vmem:[%s2800_s1 + $0x2c8] sm:$0xff]  ;;  %v415_v12 = vld [vmem:[%s2800_s1 + $0x2d0] sm:$0xff] }
  0x2f   : > { %1564 = vmatpush3.bf16.msra.mxu1 %v1563_v46  ;;  %v182_v45 = vmax.f32 %v174_v42, 0.0  ;;  %v183_v46 = vmax.f32 %v175_v43, 0.0  ;;  %v1577_v48 = vpack.c.bf16 %v412_v39, %v411_v35  ;;  %v1609_v51 = vpack.c.bf16 %v444_v41, %v443_v40  ;;  %v446_v61 = vld [vmem:[%s2800_s1 + $0x3c8] sm:$0xff]  ;;  %v400_v23 = vld [vmem:[%s2800_s1 + $0x258] sm:$0xff]  ;;  %v431_v28 = vld [vmem:[%s2800_s1 + $0x350] sm:$0xff] }
  0x30   : > { %1598 = vmatprep.subr.bf16.mxu1 %v1597_v54  ;;  %v225_v8 = vrot.slane %v224_v63, 1  ;;  %v239_v9 = vrot.slane %v238_v1, 1  ;;  %v219_v13 = vadd.f32 %v218_v0, %v217_v60  ;;  %v233_v14 = vadd.f32 %v232_v4, %v231_v62  ;;  %v413_v54 = vld [vmem:[%s2800_s1 + $0x2c0] sm:$0xff]  ;;  %v430_v11 = vld [vmem:[%s2800_s1 + $0x348] sm:$0xff]  ;;  %v432_v29 = vld [vmem:[%s2800_s1 + $0x358] sm:$0xff] }
  0x31   : > { %v198_v55 = vcombine.high %v182_v45, %v182_v45  ;;  %v241_v56 = vsel %vm212_vm0, %v182_v45, 0.0  ;;  %v199_v57 = vcombine.high %v183_v46, %v183_v46  ;;  %v255_v58 = vsel %vm212_vm0, %v183_v46, 0.0  ;;  %v445_v60 = vld [vmem:[%s2800_s1 + $0x3c0] sm:$0xff]  ;;  %v418_v31 = vld [vmem:[%s2800_s1 + $0x2e8] sm:$0xff] }
  0x32   : > { %v226_v15 = vadd.f32 %v225_v8, %v224_v63  ;;  %v240_v16 = vadd.f32 %v239_v9, %v238_v1  ;;  %v242_v63 = vrot.slane %v241_v56, 4  ;;  %v256_v1 = vrot.slane %v255_v58, 4  ;;  %v397_v4 = vld [vmem:[%s2800_s1 + $0x240] sm:$0xff]  ;;  %v402_v41 = vld [vmem:[%s2800_s1 + $0x268] sm:$0xff] }
  0x33   : > { %v248_v62 = vsel %vm212_vm0, %v198_v55, 0.0  ;;  %v262_v0 = vsel %vm212_vm0, %v199_v57, 0.0  ;;  %v1579_v2 = vpack.c.bf16 %v396_v50, %v395_v49  ;;  %v1611_v3 = vpack.c.bf16 %v428_v53, %v427_v52  ;;  %v417_v30 = vld [vmem:[%s2800_s1 + $0x2e0] sm:$0xff]  ;;  %v420_v49 = vld [vmem:[%s2800_s1 + $0x2f8] sm:$0xff]  ;;  %v451_v50 = vld [vmem:[%s2800_s1 + $0x3f0] sm:$0xff] }
  0x34   : > { %646 = vmatprep.mubr.f32.mxu0 %v226_v15  ;;  %716 = vmatprep.mubr.f32.mxu1 %v240_v16  ;;  %v249_v6 = vrot.slane %v248_v62, 4  ;;  %v263_v7 = vrot.slane %v262_v0, 4  ;;  %v1581_v8 = vpack.c.bf16 %v414_v59, %v413_v54  ;;  %v1613_v9 = vpack.c.bf16 %v446_v61, %v445_v60  ;;  %v448_v15 = vld [vmem:[%s2800_s1 + $0x3d8] sm:$0xff]  ;;  %v401_v40 = vld [vmem:[%s2800_s1 + $0x260] sm:$0xff]  ;;  %v435_v60 = vld [vmem:[%s2800_s1 + $0x370] sm:$0xff] }
  0x35   : > { %647 = vmatmul.mubr.f32.vlgmr.msra.gmra.mrb[0].mxu0 %v219_v13  ;;  %717 = vmatmul.mubr.f32.vlgmr.msra.gmra.mrb[0].mxu1 %v233_v14  ;;  %v416_v13 = vld [vmem:[%s2800_s1 + $0x2d8] sm:$0xff]  ;;  %v447_v14 = vld [vmem:[%s2800_s1 + $0x3d0] sm:$0xff]  ;;  %v257_v19 = vadd.f32 %v256_v1, %v255_v58  ;;  %v1583_v20 = vpack.c.bf16 %v398_v5, %v397_v4  ;;  %v1619_v39 = vpack.c.bf16 %v432_v29, %v431_v28  ;;  %v433_v46 = vld [vmem:[%s2800_s1 + $0x360] sm:$0xff] }
  0x36   : > { %1568 = vmatpush3.bf16.msra.mxu0 %v1567_v17  ;;  %1600 = vmatpush3.bf16.msra.mxu1 %v1599_v18  ;;  %v250_v16 = vadd.f32 %v249_v6, %v248_v62  ;;  %v264_v17 = vadd.f32 %v263_v7, %v262_v0  ;;  %v243_v18 = vadd.f32 %v242_v63, %v241_v56  ;;  %v403_v58 = vld [vmem:[%s2800_s1 + $0x270] sm:$0xff]  ;;  %v404_v59 = vld [vmem:[%s2800_s1 + $0x278] sm:$0xff]  ;;  %v469_v0 = vld [vmem:[%s2800_s1 + $0x480] sm:$0xff] }
  0x37   : > { %1570 = vmatprep.subr.bf16.mxu0 %v1569_v21  ;;  %1602 = vmatprep.subr.bf16.mxu1 %v1601_v22  ;;  %v1615_v21 = vpack.c.bf16 %v430_v11, %v429_v10  ;;  %v399_v22 = vld [vmem:[%s2800_s1 + $0x250] sm:$0xff]  ;;  %v1585_v26 = vpack.c.bf16 %v416_v13, %v415_v12  ;;  %v1617_v27 = vpack.c.bf16 %v448_v15, %v447_v14  ;;  %v436_v63 = vld [vmem:[%s2800_s1 + $0x378] sm:$0xff]  ;;  %v502_v4 = vld [vmem:[%s2800_s1 + $0x588] sm:$0xff] }
  0x38   : > { %v251_v24 = vrot.slane %v250_v16, 2  ;;  %v265_v25 = vrot.slane %v264_v17, 2  ;;  %v244_v36 = vrot.slane %v243_v18, 2  ;;  %v1591_v56 = vpack.c.bf16 %v402_v41, %v401_v40  ;;  %v170_v1 = vld [vmem:[%s2089_s17 + $0x10] sm:$0xff]  ;;  %v453_v11 = vld [vmem:[%s2800_s1 + $0x400] sm:$0xff]  ;;  %v454_v12 = vld [vmem:[%s2800_s1 + $0x408] sm:$0xff] }
  0x39   : > { %v176_v5 = vunpack.c.l.bf16 %v170_v1  ;;  %v177_v6 = vunpack.c.h.bf16 %v170_v1  ;;  %v1627_v10 = vpack.c.bf16 %v436_v63, %v435_v60  ;;  %v455_v29 = vld [vmem:[%s2800_s1 + $0x410] sm:$0xff]  ;;  %v474_v40 = vld [vmem:[%s2800_s1 + $0x4a8] sm:$0xff]  ;;  %v505_v41 = vld [vmem:[%s2800_s1 + $0x5a0] sm:$0xff] }
  0x3a   : > { %1572 = vmatpush3.bf16.msra.mxu0 %v1571_v32  ;;  %1604 = vmatpush3.bf16.msra.mxu1 %v1603_v33  ;;  %v449_v32 = vld [vmem:[%s2800_s1 + $0x3e0] sm:$0xff]  ;;  %v450_v33 = vld [vmem:[%s2800_s1 + $0x3e8] sm:$0xff]  ;;  %v252_v34 = vadd.f32 %v251_v24, %v250_v16  ;;  %v266_v35 = vadd.f32 %v265_v25, %v264_v17  ;;  %v245_v54 = vadd.f32 %v244_v36, %v243_v18  ;;  %v488_v36 = vld [vmem:[%s2800_s1 + $0x518] sm:$0xff] }
  0x3b   : > { %1574 = vmatprep.subr.bf16.mxu0 %v1573_v37  ;;  %1606 = vmatprep.subr.bf16.mxu1 %v1605_v38  ;;  %v258_v37 = vrot.slane %v257_v19, 2  ;;  %v1587_v38 = vpack.c.bf16 %v400_v23, %v399_v22  ;;  %v1621_v45 = vpack.c.bf16 %v450_v33, %v449_v32  ;;  %v2354_v13 = vmax.f32 %v176_v5, 0.0  ;;  %v485_v17 = vld [vmem:[%s2800_s1 + $0x500] sm:$0xff]  ;;  %v486_v18 = vld [vmem:[%s2800_s1 + $0x508] sm:$0xff]  ;;  %v504_v22 = vld [vmem:[%s2800_s1 + $0x598] sm:$0xff] }
  0x3c   : > { %v253_v42 = vrot.slane %v252_v34, 1  ;;  %v267_v43 = vrot.slane %v266_v35, 1  ;;  %v246_v7 = vrot.slane %v245_v54, 1  ;;  %v2356_v14 = vmax.f32 %v177_v6, 0.0  ;;  %v459_v63 = vld [vmem:[%s2800_s1 + $0x430] sm:$0xff]  ;;  %v492_v6 = vld [vmem:[%s2800_s1 + $0x538] sm:$0xff] }
  0x3d   : > { %v259_v55 = vadd.f32 %v258_v37, %v257_v19  ;;  %v471_v19 = vld [vmem:[%s2800_s1 + $0x490] sm:$0xff]  ;;  %v200_v23 = vcombine.high %v2354_v13, %v2354_v13  ;;  %v1663_v28 = vpack.c.bf16 %v486_v18, %v485_v17  ;;  %v473_v37 = vld [vmem:[%s2800_s1 + $0x4a0] sm:$0xff]  ;;  %v269_v1 = vsel %vm212_vm0, %v2354_v13, 0.0 }
  0x3e   : > { %1576 = vmatpush3.bf16.msra.mxu0 %v1575_v44  ;;  %1608 = vmatpush3.bf16.msra.mxu1 %v1607_v47  ;;  %v1589_v44 = vpack.c.bf16 %v418_v31, %v417_v30  ;;  %v434_v47 = vld [vmem:[%s2800_s1 + $0x368] sm:$0xff]  ;;  %v254_v52 = vadd.f32 %v253_v42, %v252_v34  ;;  %v268_v53 = vadd.f32 %v267_v43, %v266_v35  ;;  %v456_v30 = vld [vmem:[%s2800_s1 + $0x418] sm:$0xff]  ;;  %v487_v35 = vld [vmem:[%s2800_s1 + $0x510] sm:$0xff] }
  0x3f   : > { %1578 = vmatprep.subr.bf16.mxu0 %v1577_v48  ;;  %1610 = vmatprep.subr.bf16.mxu1 %v1609_v51  ;;  %v419_v48 = vld [vmem:[%s2800_s1 + $0x2f0] sm:$0xff]  ;;  %v452_v51 = vld [vmem:[%s2800_s1 + $0x3f8] sm:$0xff]  ;;  %v1623_v57 = vpack.c.bf16 %v434_v47, %v433_v46  ;;  %v201_v24 = vcombine.high %v2356_v14, %v2356_v14  ;;  %v247_v25 = vadd.f32 %v246_v7, %v245_v54  ;;  %v276_v31 = vsel %vm212_vm0, %v200_v23, 0.0  ;;  %v506_v42 = vld [vmem:[%s2800_s1 + $0x5a8] sm:$0xff] }
  0x40   : > { %v1593_v61 = vpack.c.bf16 %v420_v49, %v419_v48  ;;  %v1625_v62 = vpack.c.bf16 %v452_v51, %v451_v50  ;;  %786 = vmatprep.mubr.f32.mxu0 %v254_v52  ;;  %856 = vmatprep.mubr.f32.mxu1 %v268_v53  ;;  %v1667_v46 = vpack.c.bf16 %v488_v36, %v487_v35  ;;  %v457_v47 = vld [vmem:[%s2800_s1 + $0x420] sm:$0xff]  ;;  %v458_v48 = vld [vmem:[%s2800_s1 + $0x428] sm:$0xff]  ;;  %v475_v53 = vld [vmem:[%s2800_s1 + $0x4b0] sm:$0xff] }
  0x41   : > { %v290_v32 = vsel %vm212_vm0, %v201_v24, 0.0  ;;  %v1637_v49 = vpack.c.bf16 %v474_v40, %v473_v37  ;;  %v1669_v50 = vpack.c.bf16 %v506_v42, %v505_v41  ;;  %v489_v51 = vld [vmem:[%s2800_s1 + $0x520] sm:$0xff]  ;;  %v490_v52 = vld [vmem:[%s2800_s1 + $0x528] sm:$0xff]  ;;  %v491_v5 = vld [vmem:[%s2800_s1 + $0x530] sm:$0xff] }
  0x42   : > { %1580 = vmatpush3.bf16.msra.mxu0 %v1579_v2  ;;  %1612 = vmatpush3.bf16.msra.mxu1 %v1611_v3  ;;  %v470_v2 = vld [vmem:[%s2800_s1 + $0x488] sm:$0xff]  ;;  %v501_v3 = vld [vmem:[%s2800_s1 + $0x580] sm:$0xff]  ;;  %v1675_v18 = vpack.c.bf16 %v492_v6, %v491_v5  ;;  %v464_v35 = vld [vmem:[%s2800_s1 + $0x458] sm:$0xff] }
  0x43   : > { %1582 = vmatprep.subr.bf16.mxu0 %v1581_v8  ;;  %1614 = vmatprep.subr.bf16.mxu1 %v1613_v9  ;;  %v260_v8 = vrot.slane %v259_v55, 1  ;;  %v1595_v9 = vpack.c.bf16 %v404_v59, %v403_v58  ;;  %v1629_v15 = vpack.c.bf16 %v470_v2, %v469_v0  ;;  %v1661_v16 = vpack.c.bf16 %v502_v4, %v501_v3  ;;  %v508_v58 = vld [vmem:[%s2800_s1 + $0x5b8] sm:$0xff]  ;;  %v477_v7 = vld [vmem:[%s2800_s1 + $0x4c0] sm:$0xff]  ;;  %v494_v24 = vld [vmem:[%s2800_s1 + $0x548] sm:$0xff] }
  0x44   : > { %v460_v0 = vld [vmem:[%s2800_s1 + $0x438] sm:$0xff]  ;;  %v283_v2 = vsel %vm212_vm0, %v2356_v14, 0.0  ;;  %v270_v14 = vrot.slane %v269_v1, 4  ;;  %v493_v23 = vld [vmem:[%s2800_s1 + $0x540] sm:$0xff]  ;;  %v495_v40 = vld [vmem:[%s2800_s1 + $0x550] sm:$0xff] }
  0x45   : > { %v1643_v17 = vpack.c.bf16 %v460_v0, %v459_v63  ;;  %v496_v41 = vld [vmem:[%s2800_s1 + $0x558] sm:$0xff]  ;;  %v481_v42 = vld [vmem:[%s2800_s1 + $0x4e0] sm:$0xff] }
  0x46   : > { %1584 = vmatpush3.bf16.msra.mxu0 %v1583_v20  ;;  %1616 = vmatpush3.bf16.msra.mxu1 %v1615_v21  ;;  %v472_v20 = vld [vmem:[%s2800_s1 + $0x498] sm:$0xff]  ;;  %v503_v21 = vld [vmem:[%s2800_s1 + $0x590] sm:$0xff] }
  0x47   : > { %1586 = vmatprep.subr.bf16.mxu0 %v1585_v26  ;;  %1618 = vmatprep.subr.bf16.mxu1 %v1617_v27  ;;  %v261_v26 = vadd.f32 %v260_v8, %v259_v55  ;;  %v1631_v27 = vpack.c.bf16 %v454_v12, %v453_v11  ;;  %v1633_v33 = vpack.c.bf16 %v472_v20, %v471_v19  ;;  %v509_v11 = vld [vmem:[%s2800_s1 + $0x5c0] sm:$0xff]  ;;  %v510_v12 = vld [vmem:[%s2800_s1 + $0x5c8] sm:$0xff]  ;;  %v516_v63 = vld [vmem:[%s2800_s1 + $0x5f8] sm:$0xff] }
  0x48   : > { %v1665_v34 = vpack.c.bf16 %v504_v22, %v503_v21  ;;  %v461_v19 = vld [vmem:[%s2800_s1 + $0x440] sm:$0xff]  ;;  %v462_v20 = vld [vmem:[%s2800_s1 + $0x448] sm:$0xff]  ;;  %v1677_v22 = vpack.c.bf16 %v510_v12, %v509_v11  ;;  %v499_v11 = vld [vmem:[%s2800_s1 + $0x570] sm:$0xff] }
  0x4a   : > { %1588 = vmatpush3.bf16.msra.mxu0 %v1587_v38  ;;  %1620 = vmatpush3.bf16.msra.mxu1 %v1619_v39  ;;  %v277_v38 = vrot.slane %v276_v31, 4  ;;  %v291_v39 = vrot.slane %v290_v32, 4 }
  0x4b   : > { %1590 = vmatprep.subr.bf16.mxu0 %v1589_v44  ;;  %1622 = vmatprep.subr.bf16.mxu1 %v1621_v45  ;;  %v1635_v45 = vpack.c.bf16 %v456_v30, %v455_v29  ;;  %v271_v29 = vadd.f32 %v270_v14, %v269_v1  ;;  %v533_v14 = vld [vmem:[%s2800_s1 + $0x680] sm:$0xff] }
  0x4c   : > { %v278_v43 = vadd.f32 %v277_v38, %v276_v31  ;;  %v292_v44 = vadd.f32 %v291_v39, %v290_v32  ;;  %v171_v31 = vld [vmem:[%s2089_s17 + $0x18] sm:$0xff]  ;;  %v1647_v32 = vpack.c.bf16 %v462_v20, %v461_v19  ;;  %v566_v19 = vld [vmem:[%s2800_s1 + $0x788] sm:$0xff] }
  0x4d   : > { %v178_v36 = vunpack.c.l.bf16 %v171_v31  ;;  %v179_v37 = vunpack.c.h.bf16 %v171_v31  ;;  %v550_v31 = vld [vmem:[%s2800_s1 + $0x708] sm:$0xff] }
  0x4e   : > { %1592 = vmatpush3.bf16.msra.mxu0 %v1591_v56  ;;  %1624 = vmatpush3.bf16.msra.mxu1 %v1623_v57  ;;  %v279_v54 = vrot.slane %v278_v43, 2  ;;  %v293_v55 = vrot.slane %v292_v44, 2  ;;  %v476_v56 = vld [vmem:[%s2800_s1 + $0x4b8] sm:$0xff]  ;;  %v507_v57 = vld [vmem:[%s2800_s1 + $0x5b0] sm:$0xff] }
  0x4f   : > { %1594 = vmatprep.subr.bf16.mxu0 %v1593_v61  ;;  %1626 = vmatprep.subr.bf16.mxu1 %v1625_v62  ;;  %v1639_v61 = vpack.c.bf16 %v458_v48, %v457_v47  ;;  %v1671_v62 = vpack.c.bf16 %v490_v52, %v489_v51  ;;  %v1641_v3 = vpack.c.bf16 %v476_v56, %v475_v53  ;;  %v2509_v47 = vmax.f32 %v179_v37, 0.0  ;;  %v465_v52 = vld [vmem:[%s2800_s1 + $0x460] sm:$0xff]  ;;  %v466_v53 = vld [vmem:[%s2800_s1 + $0x468] sm:$0xff]  ;;  %v568_v37 = vld [vmem:[%s2800_s1 + $0x798] sm:$0xff] }
  0x50   : > { %v280_v59 = vadd.f32 %v279_v54, %v278_v43  ;;  %v294_v60 = vadd.f32 %v293_v55, %v292_v44  ;;  %v1673_v4 = vpack.c.bf16 %v508_v58, %v507_v57  ;;  %v482_v43 = vld [vmem:[%s2800_s1 + $0x4e8] sm:$0xff]  ;;  %v513_v44 = vld [vmem:[%s2800_s1 + $0x5e0] sm:$0xff]  ;;  %v1683_v51 = vpack.c.bf16 %v496_v41, %v495_v40 }
  0x51   : > { %v497_v54 = vld [vmem:[%s2800_s1 + $0x560] sm:$0xff]  ;;  %v203_v56 = vcombine.high %v2509_v47, %v2509_v47  ;;  %v1653_v57 = vpack.c.bf16 %v482_v43, %v481_v42  ;;  %v1655_v6 = vpack.c.bf16 %v466_v53, %v465_v52  ;;  %v538_v53 = vld [vmem:[%s2800_s1 + $0x6a8] sm:$0xff] }
  0x52   : > { %1596 = vmatpush3.bf16.msra.mxu0 %v1595_v9  ;;  %1628 = vmatpush3.bf16.msra.mxu1 %v1627_v10  ;;  %v281_v8 = vrot.slane %v280_v59, 1  ;;  %v295_v9 = vrot.slane %v294_v60, 1  ;;  %v478_v10 = vld [vmem:[%s2800_s1 + $0x4c8] sm:$0xff]  ;;  %v537_v52 = vld [vmem:[%s2800_s1 + $0x6a0] sm:$0xff] }
  0x53   : > { %1630 = vmatprep.subr.bf16.mxu0 %v1629_v15  ;;  %1662 = vmatprep.subr.bf16.mxu1 %v1661_v16  ;;  %v284_v16 = vrot.slane %v283_v2, 4  ;;  %v1645_v21 = vpack.c.bf16 %v478_v10, %v477_v7  ;;  %v318_v1 = vsel %vm212_vm0, %v203_v56, 0.0  ;;  %v468_v10 = vld [vmem:[%s2800_s1 + $0x478] sm:$0xff] }
  0x54   : > { %v282_v13 = vadd.f32 %v281_v8, %v280_v59  ;;  %v296_v15 = vadd.f32 %v295_v9, %v294_v60  ;;  %v498_v59 = vld [vmem:[%s2800_s1 + $0x568] sm:$0xff]  ;;  %v483_v60 = vld [vmem:[%s2800_s1 + $0x4f0] sm:$0xff]  ;;  %v319_v5 = vrot.slane %v318_v1, 4 }
  0x55   : > { %787 = vmatmul.mubr.f32.vlgmr.msra.gmra.mrb[2].mxu0 %v247_v25  ;;  %857 = vmatmul.mubr.f32.vlgmr.msra.gmra.mrb[2].mxu1 %v261_v26  ;;  %v479_v25 = vld [vmem:[%s2800_s1 + $0x4d0] sm:$0xff]  ;;  %v480_v26 = vld [vmem:[%s2800_s1 + $0x4d8] sm:$0xff]  ;;  %v285_v30 = vadd.f32 %v284_v16, %v283_v2  ;;  %v1687_v7 = vpack.c.bf16 %v498_v59, %v497_v54  ;;  %v569_v54 = vld [vmem:[%s2800_s1 + $0x7a0] sm:$0xff] }
  0x56   : > { %1632 = vmatpush3.bf16.msra.mxu0 %v1631_v27  ;;  %1664 = vmatpush3.bf16.msra.mxu1 %v1663_v28  ;;  %v511_v27 = vld [vmem:[%s2800_s1 + $0x5d0] sm:$0xff]  ;;  %v512_v28 = vld [vmem:[%s2800_s1 + $0x5d8] sm:$0xff]  ;;  %v1649_v38 = vpack.c.bf16 %v480_v26, %v479_v25 }
  0x57   : > { %1634 = vmatprep.subr.bf16.mxu0 %v1633_v33  ;;  %1666 = vmatprep.subr.bf16.mxu1 %v1665_v34  ;;  %v1679_v33 = vpack.c.bf16 %v494_v24, %v493_v23  ;;  %v463_v34 = vld [vmem:[%s2800_s1 + $0x450] sm:$0xff]  ;;  %v1681_v39 = vpack.c.bf16 %v512_v28, %v511_v27  ;;  %v517_v27 = vld [vmem:[%s2800_s1 + $0x600] sm:$0xff]  ;;  %v518_v28 = vld [vmem:[%s2800_s1 + $0x608] sm:$0xff] }
  0x58   : > { %926 = vmatprep.mubr.f32.mxu0 %v282_v13  ;;  %996 = vmatprep.mubr.f32.mxu1 %v296_v15  ;;  %v1651_v48 = vpack.c.bf16 %v464_v35, %v463_v34  ;;  %v467_v9 = vld [vmem:[%s2800_s1 + $0x470] sm:$0xff]  ;;  %v500_v13 = vld [vmem:[%s2800_s1 + $0x578] sm:$0xff]  ;;  %v534_v15 = vld [vmem:[%s2800_s1 + $0x688] sm:$0xff]  ;;  %v1695_v42 = vpack.c.bf16 %v518_v28, %v517_v27 }
  0x59   : > { %v1659_v24 = vpack.c.bf16 %v468_v10, %v467_v9  ;;  %v1691_v25 = vpack.c.bf16 %v500_v13, %v499_v11  ;;  %v1693_v26 = vpack.c.bf16 %v534_v15, %v533_v14  ;;  %v536_v35 = vld [vmem:[%s2800_s1 + $0x698] sm:$0xff]  ;;  %v311_v11 = vsel %vm212_vm0, %v2509_v47, 0.0  ;;  %v555_v14 = vld [vmem:[%s2800_s1 + $0x730] sm:$0xff]  ;;  %v573_v47 = vld [vmem:[%s2800_s1 + $0x7c0] sm:$0xff] }
  0x5a   : > { %1636 = vmatpush3.bf16.msra.mxu0 %v1635_v45  ;;  %1668 = vmatpush3.bf16.msra.mxu1 %v1667_v46  ;;  %v514_v45 = vld [vmem:[%s2800_s1 + $0x5e8] sm:$0xff]  ;;  %v2507_v46 = vmax.f32 %v178_v36, 0.0  ;;  %v567_v36 = vld [vmem:[%s2800_s1 + $0x790] sm:$0xff]  ;;  %v524_v9 = vld [vmem:[%s2800_s1 + $0x638] sm:$0xff] }
  0x5b   : > { %1638 = vmatprep.subr.bf16.mxu0 %v1637_v49  ;;  %1670 = vmatprep.subr.bf16.mxu1 %v1669_v50  ;;  %v272_v49 = vrot.slane %v271_v29, 2  ;;  %v286_v50 = vrot.slane %v285_v30, 2  ;;  %v1685_v58 = vpack.c.bf16 %v514_v45, %v513_v44  ;;  %v519_v44 = vld [vmem:[%s2800_s1 + $0x610] sm:$0xff]  ;;  %v520_v45 = vld [vmem:[%s2800_s1 + $0x618] sm:$0xff]  ;;  %v558_v27 = vld [vmem:[%s2800_s1 + $0x748] sm:$0xff] }
  0x5c   : > { %v202_v55 = vcombine.high %v2507_v46, %v2507_v46  ;;  %v297_v10 = vsel %vm212_vm0, %v2507_v46, 0.0  ;;  %v556_v15 = vld [vmem:[%s2800_s1 + $0x738] sm:$0xff]  ;;  %v542_v46 = vld [vmem:[%s2800_s1 + $0x6c8] sm:$0xff]  ;;  %v543_v28 = vld [vmem:[%s2800_s1 + $0x6d0] sm:$0xff] }
  0x5d   : > { %v273_v2 = vadd.f32 %v272_v49, %v271_v29  ;;  %v1729_v49 = vpack.c.bf16 %v568_v37, %v567_v36  ;;  %v527_v36 = vld [vmem:[%s2800_s1 + $0x650] sm:$0xff]  ;;  %v528_v37 = vld [vmem:[%s2800_s1 + $0x658] sm:$0xff] }
  0x5e   : > { %1640 = vmatpush3.bf16.msra.mxu0 %v1639_v61  ;;  %1672 = vmatpush3.bf16.msra.mxu1 %v1671_v62  ;;  %v484_v61 = vld [vmem:[%s2800_s1 + $0x4f8] sm:$0xff]  ;;  %v515_v62 = vld [vmem:[%s2800_s1 + $0x5f0] sm:$0xff]  ;;  %v304_v0 = vsel %vm212_vm0, %v202_v55, 0.0  ;;  %v570_v55 = vld [vmem:[%s2800_s1 + $0x7a8] sm:$0xff] }
  0x5f   : > { %1642 = vmatprep.subr.bf16.mxu0 %v1641_v3  ;;  %1674 = vmatprep.subr.bf16.mxu1 %v1673_v4  ;;  %v287_v3 = vadd.f32 %v286_v50, %v285_v30  ;;  %v305_v4 = vrot.slane %v304_v0, 4  ;;  %v1657_v8 = vpack.c.bf16 %v484_v61, %v483_v60  ;;  %v1689_v12 = vpack.c.bf16 %v516_v63, %v515_v62  ;;  %v549_v30 = vld [vmem:[%s2800_s1 + $0x700] sm:$0xff]  ;;  %v551_v50 = vld [vmem:[%s2800_s1 + $0x710] sm:$0xff]  ;;  %v522_v61 = vld [vmem:[%s2800_s1 + $0x628] sm:$0xff] }
  0x60   : > { %v274_v20 = vrot.slane %v273_v2, 1  ;;  %v1727_v43 = vpack.c.bf16 %v550_v31, %v549_v30  ;;  %v521_v60 = vld [vmem:[%s2800_s1 + $0x620] sm:$0xff]  ;;  %v1701_v62 = vpack.c.bf16 %v538_v53, %v537_v52  ;;  %v1733_v63 = vpack.c.bf16 %v570_v55, %v569_v54  ;;  %v575_v30 = vld [vmem:[%s2800_s1 + $0x7d0] sm:$0xff]  ;;  %v576_v31 = vld [vmem:[%s2800_s1 + $0x7d8] sm:$0xff] }
  0x61   : > { %v306_v16 = vadd.f32 %v305_v4, %v304_v0  ;;  %v553_v0 = vld [vmem:[%s2800_s1 + $0x720] sm:$0xff]  ;;  %v571_v4 = vld [vmem:[%s2800_s1 + $0x7b0] sm:$0xff]  ;;  %v530_v53 = vld [vmem:[%s2800_s1 + $0x668] sm:$0xff] }
  0x62   : > { %1644 = vmatpush3.bf16.msra.mxu0 %v1643_v17  ;;  %1676 = vmatpush3.bf16.msra.mxu1 %v1675_v18  ;;  %v320_v17 = vadd.f32 %v319_v5, %v318_v1  ;;  %v565_v18 = vld [vmem:[%s2800_s1 + $0x780] sm:$0xff]  ;;  %v554_v1 = vld [vmem:[%s2800_s1 + $0x728] sm:$0xff]  ;;  %v572_v5 = vld [vmem:[%s2800_s1 + $0x7b8] sm:$0xff] }
  0x63   : > { %1646 = vmatprep.subr.bf16.mxu0 %v1645_v21  ;;  %1678 = vmatprep.subr.bf16.mxu1 %v1677_v22  ;;  %v288_v21 = vrot.slane %v287_v3, 1  ;;  %v307_v22 = vrot.slane %v306_v16, 2  ;;  %v1725_v29 = vpack.c.bf16 %v566_v19, %v565_v18  ;;  %v1737_v13 = vpack.c.bf16 %v572_v5, %v571_v4  ;;  %v529_v52 = vld [vmem:[%s2800_s1 + $0x660] sm:$0xff]  ;;  %v532_v4 = vld [vmem:[%s2800_s1 + $0x678] sm:$0xff] }
  0x64   : > { %v321_v23 = vrot.slane %v320_v17, 2  ;;  %v298_v18 = vrot.slane %v297_v10, 4  ;;  %v312_v19 = vrot.slane %v311_v11, 4 }
  0x66   : > { %1648 = vmatpush3.bf16.msra.mxu0 %v1647_v32  ;;  %1680 = vmatpush3.bf16.msra.mxu1 %v1679_v33  ;;  %v535_v32 = vld [vmem:[%s2800_s1 + $0x690] sm:$0xff]  ;;  %v308_v33 = vadd.f32 %v307_v22, %v306_v16  ;;  %v322_v34 = vadd.f32 %v321_v23, %v320_v17  ;;  %v541_v16 = vld [vmem:[%s2800_s1 + $0x6c0] sm:$0xff]  ;;  %v574_v17 = vld [vmem:[%s2800_s1 + $0x7c8] sm:$0xff] }
  0x67   : > { %1650 = vmatprep.subr.bf16.mxu0 %v1649_v38  ;;  %1682 = vmatprep.subr.bf16.mxu1 %v1681_v39  ;;  %v275_v38 = vadd.f32 %v274_v20, %v273_v2  ;;  %v289_v39 = vadd.f32 %v288_v21, %v287_v3  ;;  %v539_v2 = vld [vmem:[%s2800_s1 + $0x6b0] sm:$0xff]  ;;  %v540_v3 = vld [vmem:[%s2800_s1 + $0x6b8] sm:$0xff]  ;;  %v1739_v21 = vpack.c.bf16 %v556_v15, %v555_v14  ;;  %v525_v22 = vld [vmem:[%s2800_s1 + $0x640] sm:$0xff] }
  0x68   : > { %v309_v40 = vrot.slane %v308_v33, 1  ;;  %v323_v41 = vrot.slane %v322_v34, 1  ;;  %v526_v23 = vld [vmem:[%s2800_s1 + $0x648] sm:$0xff] }
  0x6a   : > { %1652 = vmatpush3.bf16.msra.mxu0 %v1651_v48  ;;  %1684 = vmatpush3.bf16.msra.mxu1 %v1683_v51  ;;  %v1697_v48 = vpack.c.bf16 %v536_v35, %v535_v32  ;;  %v552_v51 = vld [vmem:[%s2800_s1 + $0x718] sm:$0xff]  ;;  %v310_v56 = vadd.f32 %v309_v40, %v308_v33  ;;  %v299_v32 = vadd.f32 %v298_v18, %v297_v10  ;;  %v559_v40 = vld [vmem:[%s2800_s1 + $0x750] sm:$0xff] }
  0x6b   : > { %1654 = vmatprep.subr.bf16.mxu0 %v1653_v57  ;;  %1686 = vmatprep.subr.bf16.mxu1 %v1685_v58  ;;  %v324_v57 = vadd.f32 %v323_v41, %v322_v34  ;;  %v1699_v58 = vpack.c.bf16 %v520_v45, %v519_v44  ;;  %v1731_v59 = vpack.c.bf16 %v552_v51, %v551_v50  ;;  %v560_v41 = vld [vmem:[%s2800_s1 + $0x758] sm:$0xff]  ;;  %v577_v44 = vld [vmem:[%s2800_s1 + $0x7e0] sm:$0xff]  ;;  %v578_v45 = vld [vmem:[%s2800_s1 + $0x7e8] sm:$0xff] }
  0x6c   : > { %v313_v33 = vadd.f32 %v312_v19, %v311_v11  ;;  %v1711_v34 = vpack.c.bf16 %v526_v23, %v525_v22  ;;  %v1715_v50 = vpack.c.bf16 %v528_v37, %v527_v36  ;;  %v1747_v51 = vpack.c.bf16 %v560_v41, %v559_v40 }
  0x6d   : > { %v1749_v55 = vpack.c.bf16 %v578_v45, %v577_v44 }
  0x6e   : > { %1656 = vmatpush3.bf16.msra.mxu0 %v1655_v6  ;;  %1688 = vmatpush3.bf16.msra.mxu1 %v1687_v7  ;;  %v1703_v6 = vpack.c.bf16 %v522_v61, %v521_v60  ;;  %v1735_v7 = vpack.c.bf16 %v554_v1, %v553_v0  ;;  %v579_v60 = vld [vmem:[%s2800_s1 + $0x7f0] sm:$0xff]  ;;  %v580_v61 = vld [vmem:[%s2800_s1 + $0x7f8] sm:$0xff]  ;;  %v1719_v0 = vpack.c.bf16 %v530_v53, %v529_v52 }
  0x6f   : > { %1658 = vmatprep.subr.bf16.mxu0 %v1657_v8  ;;  %1690 = vmatprep.subr.bf16.mxu1 %v1689_v12  ;;  %v523_v8 = vld [vmem:[%s2800_s1 + $0x630] sm:$0xff]  ;;  %v1705_v12 = vpack.c.bf16 %v540_v3, %v539_v2  ;;  %v1753_v5 = vpack.c.bf16 %v580_v61, %v579_v60 }
  0x70   : > { %v1707_v20 = vpack.c.bf16 %v524_v9, %v523_v8  ;;  %v531_v2 = vld [vmem:[%s2800_s1 + $0x670] sm:$0xff] }
  0x71   : > { %v1723_v10 = vpack.c.bf16 %v532_v4, %v531_v2 }
  0x72   : > { %1660 = vmatpush3.bf16.msra.mxu0 %v1659_v24  ;;  %1692 = vmatpush3.bf16.msra.mxu1 %v1691_v25  ;;  %v1709_v24 = vpack.c.bf16 %v542_v46, %v541_v16  ;;  %v1741_v25 = vpack.c.bf16 %v574_v17, %v573_v47  ;;  %v581_v16 = vld [vmem:[%s2801_s2] sm:$0x1] }
  0x73   : > { %1694 = vmatprep.subr.bf16.mxu0 %v1693_v26  ;;  %1726 = vmatprep.subr.bf16.mxu1 %v1725_v29  ;;  %v557_v26 = vld [vmem:[%s2800_s1 + $0x740] sm:$0xff]  ;;  %v544_v29 = vld [vmem:[%s2800_s1 + $0x6d8] sm:$0xff] }
  0x74   : > { %v1743_v35 = vpack.c.bf16 %v558_v27, %v557_v26 }
  0x75   : > { %927 = vmatmul.mubr.f32.vlgmr.msra.gmra.mrb[4].mxu0 %v275_v38  ;;  %997 = vmatmul.mubr.f32.vlgmr.msra.gmra.mrb[4].mxu1 %v289_v39  ;;  %v1713_v38 = vpack.c.bf16 %v544_v29, %v543_v28  ;;  %v1745_v39 = vpack.c.bf16 %v576_v31, %v575_v30 }
  0x76   : > { %1696 = vmatpush3.bf16.msra.mxu0 %v1695_v42  ;;  %1728 = vmatpush3.bf16.msra.mxu1 %v1727_v43  ;;  %v545_v42 = vld [vmem:[%s2800_s1 + $0x6e0] sm:$0xff]  ;;  %v546_v43 = vld [vmem:[%s2800_s1 + $0x6e8] sm:$0xff] }
  0x77   : > { %1698 = vmatprep.subr.bf16.mxu0 %v1697_v48  ;;  %1730 = vmatprep.subr.bf16.mxu1 %v1729_v49  ;;  %v300_v48 = vrot.slane %v299_v32, 2  ;;  %v314_v49 = vrot.slane %v313_v33, 2  ;;  %v1717_v54 = vpack.c.bf16 %v546_v43, %v545_v42 }
  0x78   : > { %1066 = vmatprep.mubr.f32.mxu0 %v310_v56  ;;  %1136 = vmatprep.mubr.f32.mxu1 %v324_v57  ;;  %v561_v56 = vld [vmem:[%s2800_s1 + $0x760] sm:$0xff]  ;;  %v562_v57 = vld [vmem:[%s2800_s1 + $0x768] sm:$0xff] }
  0x79   : > { %v1751_v1 = vpack.c.bf16 %v562_v57, %v561_v56 }
  0x7a   : > { %1700 = vmatpush3.bf16.msra.mxu0 %v1699_v58  ;;  %1732 = vmatpush3.bf16.msra.mxu1 %v1731_v59  ;;  %v547_v58 = vld [vmem:[%s2800_s1 + $0x6f0] sm:$0xff]  ;;  %v548_v59 = vld [vmem:[%s2800_s1 + $0x6f8] sm:$0xff] }
  0x7b   : > { %1702 = vmatprep.subr.bf16.mxu0 %v1701_v62  ;;  %1734 = vmatprep.subr.bf16.mxu1 %v1733_v63  ;;  %v301_v62 = vadd.f32 %v300_v48, %v299_v32  ;;  %v315_v63 = vadd.f32 %v314_v49, %v313_v33  ;;  %v1721_v3 = vpack.c.bf16 %v548_v59, %v547_v58 }
  0x7d   : > { %v302_v8 = vrot.slane %v301_v62, 1  ;;  %v316_v9 = vrot.slane %v315_v63, 1 }
  0x7e   : > { %1704 = vmatpush3.bf16.msra.mxu0 %v1703_v6  ;;  %1736 = vmatpush3.bf16.msra.mxu1 %v1735_v7  ;;  %v563_v6 = vld [vmem:[%s2800_s1 + $0x770] sm:$0xff]  ;;  %v564_v7 = vld [vmem:[%s2800_s1 + $0x778] sm:$0xff] }
  0x7f   : > { %1706 = vmatprep.subr.bf16.mxu0 %v1705_v12  ;;  %1738 = vmatprep.subr.bf16.mxu1 %v1737_v13  ;;  %v1755_v11 = vpack.c.bf16 %v564_v7, %v563_v6  ;;  %v303_v12 = vadd.f32 %v302_v8, %v301_v62  ;;  %v317_v13 = vadd.f32 %v316_v9, %v315_v63 }
  0x82   : > { %1708 = vmatpush3.bf16.msra.mxu0 %v1707_v20  ;;  %1740 = vmatpush3.bf16.msra.mxu1 %v1739_v21 }
  0x83   : > { %1710 = vmatprep.subr.bf16.mxu0 %v1709_v24  ;;  %1742 = vmatprep.subr.bf16.mxu1 %v1741_v25 }
  0x86   : > { %1712 = vmatpush3.bf16.msra.mxu0 %v1711_v34  ;;  %1744 = vmatpush3.bf16.msra.mxu1 %v1743_v35 }
  0x87   : > { %1714 = vmatprep.subr.bf16.mxu0 %v1713_v38  ;;  %1746 = vmatprep.subr.bf16.mxu1 %v1745_v39 }
  0x8a   : > { %1716 = vmatpush3.bf16.msra.mxu0 %v1715_v50  ;;  %1748 = vmatpush3.bf16.msra.mxu1 %v1747_v51 }
  0x8b   : > { %1718 = vmatprep.subr.bf16.mxu0 %v1717_v54  ;;  %1750 = vmatprep.subr.bf16.mxu1 %v1749_v55 }
  0x8e   : > { %1720 = vmatpush3.bf16.msra.mxu0 %v1719_v0  ;;  %1752 = vmatpush3.bf16.msra.mxu1 %v1751_v1 }
  0x8f   : > { %1722 = vmatprep.subr.bf16.mxu0 %v1721_v3  ;;  %1754 = vmatprep.subr.bf16.mxu1 %v1753_v5 }
  0x92   : > { %1724 = vmatpush3.bf16.msra.mxu0 %v1723_v10  ;;  %1756 = vmatpush3.bf16.msra.mxu1 %v1755_v11 }
  0x95   : > { %1067 = vmatmul.mubr.f32.vlgmr.msra.gmra.mrb[6].mxu0 %v303_v12  ;;  %1137 = vmatmul.mubr.f32.vlgmr.msra.gmra.mrb[6].mxu1 %v317_v13 }
 0x108   : > { %v1253_v14 = vpop.f32.mrb[0].mxu0  ;;  %v1288_v15 = vpop.f32.mrb[0].mxu1 }
 0x109   : > { %v1254_v46 = vpop.f32.mrb[1].mxu0  ;;  %v1289_v47 = vpop.f32.mrb[1].mxu1 }
 0x10a   : > { %v1255_v17 = vadd.f32 %v1254_v46, %v1253_v14  ;;  %v1290_v18 = vadd.f32 %v1289_v47, %v1288_v15 }
 0x10c   : > { %v649_v19 = vadd.f32 %v1255_v17, %v581_v16 }
 0x10e   : > { %v719_v20 = vadd.f32 %v1290_v18, %v649_v19 }
 0x128   : > { %v1323_v21 = vpop.f32.mrb[2].mxu0  ;;  %v1358_v22 = vpop.f32.mrb[2].mxu1 }
 0x129   : > { %v1324_v23 = vpop.f32.mrb[3].mxu0  ;;  %v1359_v24 = vpop.f32.mrb[3].mxu1 }
 0x12a   : > { %v1325_v25 = vadd.f32 %v1324_v23, %v1323_v21  ;;  %v1360_v26 = vadd.f32 %v1359_v24, %v1358_v22 }
 0x12c   : > { %v789_v27 = vadd.f32 %v1325_v25, %v719_v20 }
 0x12e   : > { %v859_v28 = vadd.f32 %v1360_v26, %v789_v27 }
 0x148   : > { %v1393_v29 = vpop.f32.mrb[4].mxu0  ;;  %v1428_v30 = vpop.f32.mrb[4].mxu1 }
 0x149   : > { %v1394_v31 = vpop.f32.mrb[5].mxu0  ;;  %v1429_v32 = vpop.f32.mrb[5].mxu1 }
 0x14a   : > { %v1395_v33 = vadd.f32 %v1394_v31, %v1393_v29  ;;  %v1430_v34 = vadd.f32 %v1429_v32, %v1428_v30 }
 0x14c   : > { %v929_v35 = vadd.f32 %v1395_v33, %v859_v28 }
 0x14e   : > { %v999_v36 = vadd.f32 %v1430_v34, %v929_v35 }
 0x168   : > { %v1463_v37 = vpop.f32.mrb[6].mxu0  ;;  %v1498_v38 = vpop.f32.mrb[6].mxu1 }
 0x169   : > { %v1464_v39 = vpop.f32.mrb[7].mxu0  ;;  %v1499_v40 = vpop.f32.mrb[7].mxu1 }
 0x16a   : > { %v1465_v41 = vadd.f32 %v1464_v39, %v1463_v37  ;;  %v1500_v42 = vadd.f32 %v1499_v40, %v1498_v38 }
 0x16c   : > { %v1069_v43 = vadd.f32 %v1465_v41, %v999_v36 }
 0x16e   : > { %v1139_v44 = vadd.f32 %v1500_v42, %v1069_v43 }
 0x170   : > { %1142 = vst [vmem:[%s162_s9] sm:$0x1] %v1139_v44 }
 0x171   : > { %1809 = shalt.err (!%p1806_p3)
}
 0x172   : > { %s1810_s30 = scalar_lea.hbm %s2757_s25, 16  ;;  %s1814_s4 = scalar_lea.hbm %s2802_s3, 32 }
 0x173   : > { %p1811_p4 = scmp.ne.s32.totalorder %s2757_s25, %s1810_s30  ;;  %p1815_p9 = scmp.lt.u32.totalorder %s2757_s25, %s2802_s3 }
 0x174   : > { %p1816_p10 = scmp.lt.u32.totalorder %s1814_s4, %s1810_s30  ;;  %p1818_p12 = scmp.lt.u32.totalorder %s1810_s30, %s2757_s25 }
 0x175   : > { %p1812_p7 = pnand %p1811_p4, %p1919_p5 }
 0x176   : > { %p1817_p11 = por %p1816_p10, %p1815_p9 }
 0x177   : > { %p1813_p8 = pneg %p1812_p7 }
 0x178   : > { %p1819_p13 = por %p1818_p12, %p1817_p11 }
 0x17a   : > { %p1820_p0 = pnand %p1819_p13, %p1813_p8 }
 0x17c   : > { %1823 = shalt.err (!%p1820_p0)
}
 0x17d   : > { %1757 = dma.vmem_to_hbm [thread:$0]  (%p1919_p5), %s2759_s10, 16, %s2757_s25, %s1144_s26  }
 0x17e PF: > { %p1763_p1 = scmp.ge.s32.totalorder %s1858_s15, 2  ;;  %s1168_s6 = sand.u32 1, %s1846_s12  }
 0x17f   : > { %s1169_s7 = scalar_lea.sflag [#allocation3], %s1168_s6 }
 0x180   : > { %p1760_p2 = pnand %p1763_p1, %p1923_p6 }
 0x182   : > { %1841 = dma.done.wait (!%p1760_p2), %s1169_s7, 16  }
 0x183   : > { %1843 = vsyncadd (!%p1760_p2), %s1169_s7, 4294967280  ;;  %p13_p3 = scmp.ge.s32.totalorder %s1906_s18, 4   ;;  %s2805_s12 = smov %s1850_s13 }
 0x184   : > { %s2806_s13 = smov %s1854_s14  ;;  %s2807_s14 = smov %s1917_s21 }
 0x185   : > { %s2808_s15 = smov %s1906_s18  ;;  %15 = sbr.rel (!%p13_p3) target bundleno = 3 (0x3), region = 67 }
 0x18c   :  { %1173 = vsyncpa [#allocation3], 1 }
 0x18d   :  { %1175 = vsyncpa [#allocation3 + $0x1], 1 }

</bundles_post_ra>
